<compile_context>
chip_gen: v7x
topology: tpu7x:2x2x1
jax: 0.10.0
libtpu: 0.0.40
codegen_flags: <defaults>
</compile_context>

<pallas_src>
import functools
import math

import jax
import jax.numpy as jnp
import numpy as np
from jax import lax
from jax.experimental import pallas as pl
from jax.experimental.pallas import tpu as pltpu


def _r8(v):
    """Round up to a multiple of 8 (sublane alignment)."""
    return -(-v // 8) * 8


def _dot(a, b):
    """Plain (M,K)@(K,N) matmul, f32 accumulation on the MXU."""
    return jnp.dot(a, b, preferred_element_type=jnp.float32)


def _dot_tn(a, b):
    """Contract axis 0 of a with axis 0 of b:  a:(K,M), b:(K,N) -> (M,N)."""
    return lax.dot_general(a, b, (((0,), (0,)), ((), ())),
                           preferred_element_type=jnp.float32)


def _dot_nt(a, b):
    """Contract axis 1 of a with axis 1 of b:  a:(M,K), b:(N,K) -> (M,N)."""
    return lax.dot_general(a, b, (((1,), (1,)), ((), ())),
                           preferred_element_type=jnp.float32)


# ---------------------------------------------------------------------------
# Fused forward kernel (one grid step == Bt batch elements)
# ---------------------------------------------------------------------------

def _fused_forward_kernel(
    ts_ref,      # (Bt*C, T)  batch-folded ts_out^T (rows ordered (b, c))
    rs_ref,      # (Bt*N, R)  batch-folded data_rs  (rows ordered (b, n))
    wT_ref,      # packed T-column weights: w_ts^T, w_p1, w_o1, w_o2
    wrsT_ref,    # (E, R)     rs stand-in weight, stored transposed (lane dim R)
    w2_ref,      # packed block-diagonal proj2 weights (rs block, ts block)
    bp2_ref,     # (Bt*Nn, 1) proj2 bias, tiled per folded batch element
    bias_ref,    # packed row-major biases, one bias per 8-row group
    mask_ref,    # (Bt*N, Bt*C) additive mask: 0 same batch / -1e30 cross batch
    out_ref,     # (Bt*Nn, L)
    *, T, C, N, E, L, Nn, Bt, scale):
    BtC, BtN, BtNn = Bt * C, Bt * N, Bt * Nn

    # ---- unpack weight slabs (static, 8-aligned sublane offsets) -----------
    o = 0
    w_ts_T = wT_ref[o:o + E, :]; o += _r8(E)     # (E, T)
    w_p1   = wT_ref[o:o + E, :]; o += _r8(E)     # (E, T)
    w_o1   = wT_ref[o:o + T, :]; o += _r8(T)     # (T, T)
    w_o2   = wT_ref[o:o + L, :]                  # (L, T)

    b_ts = bias_ref[0:1,   :E]                   # (1, E)
    b_rs = bias_ref[8:9,   :E]                   # (1, E)
    b_p1 = bias_ref[16:17, :T]                   # (1, T)
    b_o1 = bias_ref[24:25, :T]                   # (1, T)
    b_o2 = bias_ref[32:33, :L]                   # (1, L)

    rNn = _r8(BtNn)
    w2_rs = w2_ref[0:BtNn, :BtN]                 # (Bt*Nn, Bt*N)  block-diag
    w2_ts = w2_ref[rNn:rNn + BtNn, :BtC]         # (Bt*Nn, Bt*C)  block-diag

    tsT = ts_ref[...].astype(jnp.float32)        # (Bt*C, T)
    rs  = rs_ref[...].astype(jnp.float32)        # (Bt*N, R)

    # --- series decomposition + TimesBlock stack ----------------------------
    # TODO(synk): TimesBlock is not defined in the reference source; with the
    # identity stand-in, seasonal + trend == data_ts exactly, so the replicate-
    # padded moving-average matmul is dead and elided (reintroduce the (T,T)
    # averaging-matrix formulation when a real TimesBlock consumes seasonal and
    # trend separately).

    # --- ts_linear on the transposed series ---------------------------------
    ts_fusion = _dot_nt(tsT, w_ts_T) + b_ts              # (Bt*C, E)

    # TODO(synk): Conv rs_block is not defined in the reference; linear stand-in.
    rs_out = _dot_nt(rs, wrsT_ref[...]) + b_rs           # (Bt*N, E)

    # TODO(synk): MultiModalAttentionGraph not defined; scaled-dot softmax
    # stand-in.  One MXU matmul covers all Bt folded batch elements; the
    # additive block-diagonal mask keeps batches separated in the softmax.
    scores = _dot_nt(rs_out, ts_fusion) * scale + mask_ref[...]   # (Bt*N, Bt*C)
    m = jnp.max(scores, axis=-1, keepdims=True)
    e = jnp.exp(scores - m)                                       # EUP
    denom = jnp.sum(e, axis=-1, keepdims=True)
    graph = e * pl.reciprocal(denom, approx=True)                 # block-diagonal

    # TODO(synk): ModalFusion not defined; graph-mixed concat stand-in.
    # Cross-batch terms vanish because `graph` is block-diagonal.
    rs_mix = rs_out + _dot(graph, ts_fusion)             # (Bt*N, E)
    ts_mix = ts_fusion + _dot_tn(graph, rs_out)          # (Bt*C, E)

    # --- projection head: proj1 + ReLU, proj2 (1x1 conv, kept transposed) ---
    h_rs = jnp.maximum(_dot(rs_mix, w_p1) + b_p1, 0.0)   # (Bt*N, T)
    h_ts = jnp.maximum(_dot(ts_mix, w_p1) + b_p1, 0.0)   # (Bt*C, T)
    res2T = _dot(w2_rs, h_rs) + _dot(w2_ts, h_ts) + bp2_ref[...]   # (Bt*Nn, T)

    outT = tsT + res2T                                    # (Bt*Nn, T)  (C == Nn)

    # --- output 1x1 convs, kept transposed so the lane dim stays T-wide -----
    o1T = jnp.maximum(_dot_nt(outT, w_o1) + b_o1, 0.0)    # (Bt*Nn, T)
    o2T = _dot_nt(o1T, w_o2) + b_o2                       # (Bt*Nn, L)

    out_ref[...] = o2T.astype(out_ref.dtype)


# ---------------------------------------------------------------------------
# Wrapper: single pallas_call for the whole forward pass
# ---------------------------------------------------------------------------

def _pick_block_batch(B, C, N, Nn, max_bt):
    """Largest batch fold that keeps every block's sublane dim a multiple of 8
    and (when possible) leaves >= 2 grid steps so v7x's second TC has work."""
    def ok(bt):
        return (bt * C) % 8 == 0 and (bt * N) % 8 == 0 and (bt * Nn) % 8 == 0
    cands = [d for d in range(1, min(B, max_bt) + 1) if B % d == 0 and ok(d)]
    two_step = [d for d in cands if B // d >= 2]
    if two_step:
        return max(two_step)
    if cands:
        return max(cands)
    return B  # fall back: one block spanning the whole (small) batch


def model_forward(params, cfg, data_ts, data_rs, *, max_block_batch=16):
    B, T, C = data_ts.shape
    _, N, R = data_rs.shape
    E, L, Nn = cfg.embed_dim, cfg.label_len, cfg.num_nodes
    assert C == Nn, "out = ts_out + res_out requires num_channels == num_nodes"
    assert T == cfg.seq_len

    Bt = _pick_block_batch(B, C, N, Nn, max_block_batch)
    steps = B // Bt
    BtC, BtN, BtNn = Bt * C, Bt * N, Bt * Nn

    # ---- host-side data layout: fold batch into the row (sublane) dim ------
    ts2d = jnp.transpose(data_ts, (0, 2, 1)).reshape(B * C, T)    # rows (b, c)
    rs2d = data_rs.reshape(B * N, R)                              # rows (b, n)

    # ---- host-side weight packing (few, lane-dense DMAs) -------------------
    w_ts_T, b_ts = params["ts_linear"]      # (E, T), (E,)
    w_rs_T, b_rs = params["rs_linear"]      # (E, R), (E,)
    w_p1,  b_p1  = params["proj1"]          # (T, E), (T,)
    w_p2,  b_p2  = params["proj2"]          # (Nn, N+C), (Nn,)
    w_o1,  b_o1  = params["out_linear1"]    # (T, T), (T,)
    w_o2,  b_o2  = params["out_linear2"]    # (L, T), (L,)

    def pad_rows(a, rows):
        return jnp.pad(a, ((0, rows - a.shape[0]), (0, 0)))

    wT_slab = jnp.concatenate([
        pad_rows(w_ts_T, _r8(E)),
        pad_rows(w_p1.T, _r8(E)),
        pad_rows(w_o1, _r8(T)),
        pad_rows(w_o2, _r8(L)),
    ], axis=0)                                                    # (., T)

    bias_w = max(E, T, L)
    def bias_row(v):                                              # (8, bias_w)
        return jnp.pad(v.reshape(1, -1), ((0, 7), (0, bias_w - v.shape[0])))
    bias_slab = jnp.concatenate(
        [bias_row(v) for v in (b_ts, b_rs, b_p1, b_o1, b_o2)], axis=0)  # (40, .)

    eye = jnp.eye(Bt, dtype=jnp.float32)
    w2_rs_bd = jnp.kron(eye, w_p2[:, :N])                         # (BtNn, BtN)
    w2_ts_bd = jnp.kron(eye, w_p2[:, N:])                         # (BtNn, BtC)
    rNn = _r8(BtNn)
    w2_cols = max(BtN, BtC)
    w2_slab = jnp.concatenate([
        jnp.pad(w2_rs_bd, ((0, rNn - BtNn), (0, w2_cols - BtN))),
        jnp.pad(w2_ts_bd, ((0, rNn - BtNn), (0, w2_cols - BtC))),
    ], axis=0)                                                    # (2*rNn, .)
    bp2_col = jnp.tile(b_p2.reshape(Nn, 1), (Bt, 1))              # (BtNn, 1)

    attn_mask = jnp.where(
        jnp.kron(eye, jnp.ones((N, C), jnp.float32)) > 0.0,
        0.0, -1e30).astype(jnp.float32)                           # (BtN, BtC)

    kern = functools.partial(_fused_forward_kernel, T=T, C=C, N=N, E=E, L=L,
                             Nn=Nn, Bt=Bt, scale=1.0 / math.sqrt(E))

    def full(shape):
        return pl.BlockSpec(shape, lambda i: (0, 0))

    in_specs = [
        pl.BlockSpec((BtC, T), lambda i: (i, 0)),    # batch-folded ts_out^T
        pl.BlockSpec((BtN, R), lambda i: (i, 0)),    # batch-folded data_rs
        full(wT_slab.shape),
        full(w_rs_T.shape),
        full(w2_slab.shape),
        full(bp2_col.shape),
        full(bias_slab.shape),
        full(attn_mask.shape),
    ]
    out_specs = pl.BlockSpec((BtNn, L), lambda i: (i, 0))

    # Advisory cost estimate (helps XLA schedule around the custom call).
    mm = lambda m, k, n: 2 * m * k * n
    flops = steps * (
        mm(BtC, T, E) + mm(BtN, R, E) + 3 * mm(BtN, E, BtC)
        + mm(BtN, E, T) + mm(BtC, E, T)
        + mm(BtNn, BtN, T) + mm(BtNn, BtC, T)
        + mm(BtNn, T, T) + mm(BtNn, T, L))
    transcendentals = steps * (BtN * BtC + BtN)
    bytes_accessed = 4 * (ts2d.size + rs2d.size + B * Nn * L
                          + steps * (wT_slab.size + w_rs_T.size + w2_slab.size
                                     + bp2_col.size + bias_slab.size
                                     + attn_mask.size))

    out2d = pl.pallas_call(
        kern,
        out_shape=jax.ShapeDtypeStruct((B * Nn, L), jnp.float32),
        grid_spec=pltpu.PrefetchScalarGridSpec(
            num_scalar_prefetch=0,
            grid=(steps,),
            in_specs=in_specs,
            out_specs=out_specs,
        ),
        compiler_params=pltpu.CompilerParams(
            dimension_semantics=("parallel",)),
        cost_estimate=pl.CostEstimate(
            flops=int(flops),
            transcendentals=int(transcendentals),
            bytes_accessed=int(bytes_accessed)),
    )(ts2d, rs2d, wT_slab, w_rs_T, w2_slab, bp2_col, bias_slab, attn_mask)

    # (B*Nn, L) -> (B, L, Nn)
    return jnp.transpose(out2d.reshape(B, Nn, L), (0, 2, 1))


# ---------------------------------------------------------------------------
# Pure-JAX reference (same stand-ins) — used only for a parity check
# ---------------------------------------------------------------------------

def reference_forward(params, cfg, data_ts, data_rs):
    E = cfg.embed_dim
    w_ts, b_ts = params["ts_linear"]
    w_rs, b_rs = params["rs_linear"]
    w_p1, b_p1 = params["proj1"]
    w_p2, b_p2 = params["proj2"]
    w_o1, b_o1 = params["out_linear1"]
    w_o2, b_o2 = params["out_linear2"]

    ts_out = data_ts                                    # decomp + identity blocks
    ts_fusion = jnp.einsum("btc,et->bce", ts_out, w_ts) + b_ts
    rs_out = jnp.einsum("bnr,er->bne", data_rs, w_rs) + b_rs
    scores = jnp.einsum("bne,bce->bnc", rs_out, ts_fusion) / math.sqrt(E)
    graph = jax.nn.softmax(scores, axis=-1)
    rs_mix = rs_out + jnp.einsum("bnc,bce->bne", graph, ts_fusion)
    ts_mix = ts_fusion + jnp.einsum("bnc,bne->bce", graph, rs_out)
    fusion = jnp.concatenate([rs_mix, ts_mix], axis=1)
    h = jax.nn.relu(jnp.einsum("bfe,te->bft", fusion, w_p1) + b_p1)
    res = jnp.einsum("nf,bft->btn", w_p2, h) + b_p2
    out = ts_out + res
    o1 = jax.nn.relu(jnp.einsum("st,btn->bsn", w_o1, out) + b_o1[None, :, None])
    o2 = jnp.einsum("ls,bsn->bln", w_o2, o1) + b_o2[None, :, None]
    return o2


# ---------------------------------------------------------------------------
# Parameters
# ---------------------------------------------------------------------------

class Configs:
    seq_len = 48
    label_len = 24
    num_channels = 4
    num_nodes = 4        # must equal num_channels (residual add in the model)
    embed_dim = 32
    ts_layers = 1


def init_params(cfg, key):
    T, E, L, Nn = cfg.seq_len, cfg.embed_dim, cfg.label_len, cfg.num_nodes
    fusion_dim = cfg.num_channels + cfg.num_nodes
    ks = jax.random.split(key, 6)

    def torch_linear(k, fan_in, fan_out):
        """(out, in) weight + (out,) bias, U(-1/sqrt(fan_in), 1/sqrt(fan_in))."""
        kw, kb = jax.random.split(k)
        s = 1.0 / math.sqrt(fan_in)
        w = jax.random.uniform(kw, (fan_out, fan_in), jnp.float32, -s, s)
        b = jax.random.uniform(kb, (fan_out,), jnp.float32, -s, s)
        return w, b

    return {
        "ts_linear": torch_linear(ks[0], T, E),        # Linear(seq_len, embed_dim)
        "rs_linear": torch_linear(ks[1], 196, E),      # TODO(synk): rs_block stand-in
        "proj1": torch_linear(ks[2], E, T),            # Linear(embed_dim, seq_len)
        "proj2": torch_linear(ks[3], fusion_dim, Nn),  # Conv1d(fusion, nodes, k=1)
        "out_linear1": torch_linear(ks[4], T, T),      # Conv1d(seq, seq, k=1)
        "out_linear2": torch_linear(ks[5], T, L),      # Conv1d(seq, label, k=1)
    }


# ---------------------------------------------------------------------------
# Main
# ---------------------------------------------------------------------------

if __name__ == "__main__":
    cfg = Configs()
    key = jax.random.PRNGKey(0)
    k1, k2, k3 = jax.random.split(key, 3)

    B = 8
    data_ts = jax.random.normal(k1, (B, cfg.seq_len, cfg.num_channels), jnp.float32)
    data_rs = jax.random.normal(k2, (B, cfg.num_nodes, 196), jnp.float32)
    params = init_params(cfg, k3)

    out = jax.block_until_ready(model_forward(params, cfg, data_ts, data_rs))
    assert out.shape == (B, cfg.label_len, cfg.num_nodes), out.shape

    ref = jax.block_until_ready(reference_forward(params, cfg, data_ts, data_rs))
    np.testing.assert_allclose(np.asarray(out), np.asarray(ref),
                               rtol=3e-2, atol=3e-2)

    print("KERNEL_OK")
</pallas_src>

<mosaic_0001>
module attributes {stable_mosaic.version = 11 : i64} {
  func.func @_fused_forward_kernel(%arg0: i32, %arg1: memref<16x48xf32, #tpu.memory_space<vmem>>, %arg2: memref<16x196xf32, #tpu.memory_space<vmem>>, %arg3: memref<136x48xf32, #tpu.memory_space<vmem>>, %arg4: memref<32x196xf32, #tpu.memory_space<vmem>>, %arg5: memref<32x16xf32, #tpu.memory_space<vmem>>, %arg6: memref<16x1xf32, #tpu.memory_space<vmem>>, %arg7: memref<40x48xf32, #tpu.memory_space<vmem>>, %arg8: memref<16x16xf32, #tpu.memory_space<vmem>>, %arg9: memref<16x24xf32, #tpu.memory_space<vmem>>) attributes {dimension_semantics = [#tpu.dimension_semantics<parallel>], iteration_bounds = array<i64: 2>, scalar_prefetch = 0 : i64, scratch_operands = 0 : i64, tpu.core_type = #tpu.core_type<tc>, window_params = [{transform_indices = @transform_0, window_bounds = array<i64: 16, 48>}, {transform_indices = @transform_1, window_bounds = array<i64: 16, 196>}, {pipeline_mode = #tpu.pipeline_mode<synchronous>, transform_indices = @transform_2, window_bounds = array<i64: 136, 48>}, {pipeline_mode = #tpu.pipeline_mode<synchronous>, transform_indices = @transform_3, window_bounds = array<i64: 32, 196>}, {pipeline_mode = #tpu.pipeline_mode<synchronous>, transform_indices = @transform_4, window_bounds = array<i64: 32, 16>}, {pipeline_mode = #tpu.pipeline_mode<synchronous>, transform_indices = @transform_5, window_bounds = array<i64: 16, 1>}, {pipeline_mode = #tpu.pipeline_mode<synchronous>, transform_indices = @transform_6, window_bounds = array<i64: 40, 48>}, {pipeline_mode = #tpu.pipeline_mode<synchronous>, transform_indices = @transform_7, window_bounds = array<i64: 16, 16>}, {transform_indices = @transform_8, window_bounds = array<i64: 16, 24>}]} {
    %c0 = arith.constant 0 : index
    %c0_0 = arith.constant 0 : index
    %0 = vector.load %arg3[%c0, %c0_0] : memref<136x48xf32, #tpu.memory_space<vmem>>, vector<32x48xf32>
    %c32 = arith.constant 32 : index
    %c0_1 = arith.constant 0 : index
    %1 = vector.load %arg3[%c32, %c0_1] : memref<136x48xf32, #tpu.memory_space<vmem>>, vector<32x48xf32>
    %c64 = arith.constant 64 : index
    %c0_2 = arith.constant 0 : index
    %2 = vector.load %arg3[%c64, %c0_2] : memref<136x48xf32, #tpu.memory_space<vmem>>, vector<48x48xf32>
    %c112 = arith.constant 112 : index
    %c0_3 = arith.constant 0 : index
    %3 = vector.load %arg3[%c112, %c0_3] : memref<136x48xf32, #tpu.memory_space<vmem>>, vector<24x48xf32>
    %c0_4 = arith.constant 0 : index
    %c0_5 = arith.constant 0 : index
    %4 = vector.load %arg7[%c0_4, %c0_5] : memref<40x48xf32, #tpu.memory_space<vmem>>, vector<1x32xf32>
    %c8 = arith.constant 8 : index
    %c0_6 = arith.constant 0 : index
    %5 = vector.load %arg7[%c8, %c0_6] : memref<40x48xf32, #tpu.memory_space<vmem>>, vector<1x32xf32>
    %c16 = arith.constant 16 : index
    %c0_7 = arith.constant 0 : index
    %6 = vector.load %arg7[%c16, %c0_7] : memref<40x48xf32, #tpu.memory_space<vmem>>, vector<1x48xf32>
    %c24 = arith.constant 24 : index
    %c0_8 = arith.constant 0 : index
    %7 = vector.load %arg7[%c24, %c0_8] : memref<40x48xf32, #tpu.memory_space<vmem>>, vector<1x48xf32>
    %c32_9 = arith.constant 32 : index
    %c0_10 = arith.constant 0 : index
    %8 = vector.load %arg7[%c32_9, %c0_10] : memref<40x48xf32, #tpu.memory_space<vmem>>, vector<1x24xf32>
    %c0_11 = arith.constant 0 : index
    %c0_12 = arith.constant 0 : index
    %9 = vector.load %arg5[%c0_11, %c0_12] : memref<32x16xf32, #tpu.memory_space<vmem>>, vector<16x16xf32>
    %c16_13 = arith.constant 16 : index
    %c0_14 = arith.constant 0 : index
    %10 = vector.load %arg5[%c16_13, %c0_14] : memref<32x16xf32, #tpu.memory_space<vmem>>, vector<16x16xf32>
    %c0_15 = arith.constant 0 : index
    %c0_16 = arith.constant 0 : index
    %11 = vector.load %arg1[%c0_15, %c0_16] : memref<16x48xf32, #tpu.memory_space<vmem>>, vector<16x48xf32>
    %c0_17 = arith.constant 0 : index
    %c0_18 = arith.constant 0 : index
    %12 = vector.load %arg2[%c0_17, %c0_18] : memref<16x196xf32, #tpu.memory_space<vmem>>, vector<16x196xf32>
    %cst = arith.constant dense<0.000000e+00> : vector<16x32xf32>
    %13 = tpu.matmul %11, %0, %cst {dimension_numbers = #tpu.dot_dimension_numbers<[1], [1], [0], [0], [0, 0, 1, 0], [], []>} : vector<16x48xf32>, vector<32x48xf32>, vector<16x32xf32> -> vector<16x32xf32>
    %14 = vector.broadcast %4 : vector<1x32xf32> to vector<16x32xf32>
    %15 = arith.addf %13, %14 : vector<16x32xf32>
    %c0_19 = arith.constant 0 : index
    %c0_20 = arith.constant 0 : index
    %16 = vector.load %arg4[%c0_19, %c0_20] : memref<32x196xf32, #tpu.memory_space<vmem>>, vector<32x196xf32>
    %cst_21 = arith.constant dense<0.000000e+00> : vector<16x32xf32>
    %17 = tpu.matmul %12, %16, %cst_21 {dimension_numbers = #tpu.dot_dimension_numbers<[1], [1], [0], [0], [0, 0, 1, 0], [], []>} : vector<16x196xf32>, vector<32x196xf32>, vector<16x32xf32> -> vector<16x32xf32>
    %18 = vector.broadcast %5 : vector<1x32xf32> to vector<16x32xf32>
    %19 = arith.addf %17, %18 : vector<16x32xf32>
    %cst_22 = arith.constant dense<0.000000e+00> : vector<16x16xf32>
    %20 = tpu.matmul %19, %15, %cst_22 {dimension_numbers = #tpu.dot_dimension_numbers<[1], [1], [0], [0], [0, 0, 1, 0], [], []>} : vector<16x32xf32>, vector<16x32xf32>, vector<16x16xf32> -> vector<16x16xf32>
    %cst_23 = arith.constant 0.176776692 : f32
    %21 = vector.broadcast %cst_23 : f32 to vector<16x16xf32>
    %22 = arith.mulf %20, %21 : vector<16x16xf32>
    %c0_24 = arith.constant 0 : index
    %c0_25 = arith.constant 0 : index
    %23 = vector.load %arg8[%c0_24, %c0_25] : memref<16x16xf32, #tpu.memory_space<vmem>>, vector<16x16xf32>
    %24 = arith.addf %22, %23 : vector<16x16xf32>
    %cst_26 = arith.constant dense<0xFF800000> : vector<16xf32>
    %25 = vector.multi_reduction <maximumf>, %24, %cst_26 [1] : vector<16x16xf32> to vector<16xf32>
    %26 = vector.shape_cast %25 : vector<16xf32> to vector<16x1xf32>
    %27 = vector.broadcast %26 : vector<16x1xf32> to vector<16x16xf32>
    %28 = arith.subf %24, %27 : vector<16x16xf32>
    %29 = math.exp %28 : vector<16x16xf32>
    %cst_27 = arith.constant dense<0.000000e+00> : vector<16xf32>
    %30 = vector.multi_reduction <add>, %29, %cst_27 [1] : vector<16x16xf32> to vector<16xf32>
    %31 = vector.shape_cast %30 : vector<16xf32> to vector<16x1xf32>
    %32 = tpu.reciprocal %31 {approx = true} : vector<16x1xf32> -> vector<16x1xf32>
    %33 = vector.broadcast %32 : vector<16x1xf32> to vector<16x16xf32>
    %34 = arith.mulf %29, %33 : vector<16x16xf32>
    %cst_28 = arith.constant dense<0.000000e+00> : vector<16x32xf32>
    %35 = tpu.matmul %34, %15, %cst_28 {dimension_numbers = #tpu.dot_dimension_numbers<[1], [0], [0], [1], [0, 0, 1, 1], [], []>} : vector<16x16xf32>, vector<16x32xf32>, vector<16x32xf32> -> vector<16x32xf32>
    %36 = arith.addf %19, %35 : vector<16x32xf32>
    %cst_29 = arith.constant dense<0.000000e+00> : vector<16x32xf32>
    %37 = tpu.matmul %34, %19, %cst_29 {dimension_numbers = #tpu.dot_dimension_numbers<[0], [0], [1], [1], [0, 1, 1, 1], [], []>} : vector<16x16xf32>, vector<16x32xf32>, vector<16x32xf32> -> vector<16x32xf32>
    %38 = arith.addf %15, %37 : vector<16x32xf32>
    %cst_30 = arith.constant dense<0.000000e+00> : vector<16x48xf32>
    %39 = tpu.matmul %36, %1, %cst_30 {dimension_numbers = #tpu.dot_dimension_numbers<[1], [0], [0], [1], [0, 0, 1, 1], [], []>} : vector<16x32xf32>, vector<32x48xf32>, vector<16x48xf32> -> vector<16x48xf32>
    %40 = vector.broadcast %6 : vector<1x48xf32> to vector<16x48xf32>
    %41 = arith.addf %39, %40 : vector<16x48xf32>
    %cst_31 = arith.constant 0.000000e+00 : f32
    %42 = vector.broadcast %cst_31 : f32 to vector<16x48xf32>
    %43 = arith.maximumf %41, %42 : vector<16x48xf32>
    %cst_32 = arith.constant dense<0.000000e+00> : vector<16x48xf32>
    %44 = tpu.matmul %38, %1, %cst_32 {dimension_numbers = #tpu.dot_dimension_numbers<[1], [0], [0], [1], [0, 0, 1, 1], [], []>} : vector<16x32xf32>, vector<32x48xf32>, vector<16x48xf32> -> vector<16x48xf32>
    %45 = vector.broadcast %6 : vector<1x48xf32> to vector<16x48xf32>
    %46 = arith.addf %44, %45 : vector<16x48xf32>
    %cst_33 = arith.constant 0.000000e+00 : f32
    %47 = vector.broadcast %cst_33 : f32 to vector<16x48xf32>
    %48 = arith.maximumf %46, %47 : vector<16x48xf32>
    %cst_34 = arith.constant dense<0.000000e+00> : vector<16x48xf32>
    %49 = tpu.matmul %9, %43, %cst_34 {dimension_numbers = #tpu.dot_dimension_numbers<[1], [0], [0], [1], [0, 0, 1, 1], [], []>} : vector<16x16xf32>, vector<16x48xf32>, vector<16x48xf32> -> vector<16x48xf32>
    %cst_35 = arith.constant dense<0.000000e+00> : vector<16x48xf32>
    %50 = tpu.matmul %10, %48, %cst_35 {dimension_numbers = #tpu.dot_dimension_numbers<[1], [0], [0], [1], [0, 0, 1, 1], [], []>} : vector<16x16xf32>, vector<16x48xf32>, vector<16x48xf32> -> vector<16x48xf32>
    %51 = arith.addf %49, %50 : vector<16x48xf32>
    %c0_36 = arith.constant 0 : index
    %c0_37 = arith.constant 0 : index
    %52 = vector.load %arg6[%c0_36, %c0_37] : memref<16x1xf32, #tpu.memory_space<vmem>>, vector<16x1xf32>
    %53 = vector.broadcast %52 : vector<16x1xf32> to vector<16x48xf32>
    %54 = arith.addf %51, %53 : vector<16x48xf32>
    %55 = arith.addf %11, %54 : vector<16x48xf32>
    %cst_38 = arith.constant dense<0.000000e+00> : vector<16x48xf32>
    %56 = tpu.matmul %55, %2, %cst_38 {dimension_numbers = #tpu.dot_dimension_numbers<[1], [1], [0], [0], [0, 0, 1, 0], [], []>} : vector<16x48xf32>, vector<48x48xf32>, vector<16x48xf32> -> vector<16x48xf32>
    %57 = vector.broadcast %7 : vector<1x48xf32> to vector<16x48xf32>
    %58 = arith.addf %56, %57 : vector<16x48xf32>
    %cst_39 = arith.constant 0.000000e+00 : f32
    %59 = vector.broadcast %cst_39 : f32 to vector<16x48xf32>
    %60 = arith.maximumf %58, %59 : vector<16x48xf32>
    %cst_40 = arith.constant dense<0.000000e+00> : vector<16x24xf32>
    %61 = tpu.matmul %60, %3, %cst_40 {dimension_numbers = #tpu.dot_dimension_numbers<[1], [1], [0], [0], [0, 0, 1, 0], [], []>} : vector<16x48xf32>, vector<24x48xf32>, vector<16x24xf32> -> vector<16x24xf32>
    %62 = vector.broadcast %8 : vector<1x24xf32> to vector<16x24xf32>
    %63 = arith.addf %61, %62 : vector<16x24xf32>
    %c0_41 = arith.constant 0 : index
    %c0_42 = arith.constant 0 : index
    %64 = vector.load %arg9[%c0_41, %c0_42] : memref<16x24xf32, #tpu.memory_space<vmem>>, vector<16x24xf32>
    tpu.vector_store %arg9[%c0_41, %c0_42], %63 {strides = array<i32>} : memref<16x24xf32, #tpu.memory_space<vmem>>, vector<16x24xf32>,
    return
  }
  func.func @transform_0(%arg0: i32) -> (i32, i32) {
    %c0_i32 = arith.constant 0 : i32
    %c0_i32_0 = arith.constant 0 : i32
    return %arg0, %c0_i32 : i32, i32
  }
  func.func @transform_1(%arg0: i32) -> (i32, i32) {
    %c0_i32 = arith.constant 0 : i32
    %c0_i32_0 = arith.constant 0 : i32
    return %arg0, %c0_i32 : i32, i32
  }
  func.func @transform_2(%arg0: i32) -> (i32, i32) {
    %c0_i32 = arith.constant 0 : i32
    %c0_i32_0 = arith.constant 0 : i32
    %c0_i32_1 = arith.constant 0 : i32
    return %c0_i32, %c0_i32_0 : i32, i32
  }
  func.func @transform_3(%arg0: i32) -> (i32, i32) {
    %c0_i32 = arith.constant 0 : i32
    %c0_i32_0 = arith.constant 0 : i32
    %c0_i32_1 = arith.constant 0 : i32
    return %c0_i32, %c0_i32_0 : i32, i32
  }
  func.func @transform_4(%arg0: i32) -> (i32, i32) {
    %c0_i32 = arith.constant 0 : i32
    %c0_i32_0 = arith.constant 0 : i32
    %c0_i32_1 = arith.constant 0 : i32
    return %c0_i32, %c0_i32_0 : i32, i32
  }
  func.func @transform_5(%arg0: i32) -> (i32, i32) {
    %c0_i32 = arith.constant 0 : i32
    %c0_i32_0 = arith.constant 0 : i32
    %c0_i32_1 = arith.constant 0 : i32
    return %c0_i32, %c0_i32_0 : i32, i32
  }
  func.func @transform_6(%arg0: i32) -> (i32, i32) {
    %c0_i32 = arith.constant 0 : i32
    %c0_i32_0 = arith.constant 0 : i32
    %c0_i32_1 = arith.constant 0 : i32
    return %c0_i32, %c0_i32_0 : i32, i32
  }
  func.func @transform_7(%arg0: i32) -> (i32, i32) {
    %c0_i32 = arith.constant 0 : i32
    %c0_i32_0 = arith.constant 0 : i32
    %c0_i32_1 = arith.constant 0 : i32
    return %c0_i32, %c0_i32_0 : i32, i32
  }
  func.func @transform_8(%arg0: i32) -> (i32, i32) {
    %c0_i32 = arith.constant 0 : i32
    %c0_i32_0 = arith.constant 0 : i32
    return %arg0, %c0_i32 : i32, i32
  }
}

</mosaic_0001>

<bundles_post_ra>
// kernel: tpu_custom_call.1
= control target key start
LH: loop header
LB: loop body
LE: loop exit
PB: predicated region body
PF: predicated region fallthrough
CT: control target
= control target key end

     0   :  { %s1867_s27 = smov 0   ;;  %s2105_s0 = inlined_call_operand.vmem [shape: f32[32,48], index: 0, kind: input, shape index: {}]   ;;  %s2106_s1 = inlined_call_operand.vmem [shape: f32[32,196], index: 1, kind: input, shape index: {}]   ;;  %s2107_s2 = inlined_call_operand.vmem [shape: f32[136,48], index: 2, kind: input, shape index: {}]   ;;  %s2108_s3 = inlined_call_operand.vmem [shape: f32[32,196], index: 3, kind: input, shape index: {}]   ;;  %s2109_s4 = inlined_call_operand.vmem [shape: f32[32,16], index: 4, kind: input, shape index: {}]   ;;  %s2110_s5 = inlined_call_operand.vmem [shape: f32[16,1], index: 5, kind: input, shape index: {}]   ;;  %s2111_s6 = inlined_call_operand.vmem [shape: f32[40,48], index: 6, kind: input, shape index: {}]   ;;  %s2112_s7 = inlined_call_operand.vmem [shape: f32[16,16], index: 7, kind: input, shape index: {}]   ;;  %s2113_s8 = inlined_call_operand.vmem [shape: f32[32,24], index: 8, kind: output, shape index: {}]  }
   0x1 LB: > { %s1503_s28 = sadd.s32 4294967295, %s1819_s27   ;;  %p1507_p0 = scmp.ge.s32.totalorder %s1819_s27, 1  ;;  %s1819_s27 = sphi %s1867_s27, %s18_s27  }
   0x2   : > { %p275_p1 = scmp.lt.s32.totalorder %s1819_s27, 3 }
   0x4   : > { %p276_p2 = pnand %p1507_p0, %p275_p1 }
   0x5   : > { %v334_v0 = vld [vmem:[%s2107_s2] sm:$0xff] (!%p276_p2)  ;;  %v335_v1 = vld [vmem:[%s2107_s2 + $0x8] sm:$0xff] (!%p276_p2)  ;;  %vm370_vm0 = vcmask (!%p276_p2), 392192   ;;  %vm476_vm1 = vcmask (!%p276_p2), 556032   ;;  %s1508_s13 = sshll.u32 (!%p276_p2), %s1503_s28, 1  ;;  %v467_v5 = vld [vmem:[%s2108_s3 + $0x18] sm:$0xff] (!%p276_p2) }
   0x6   : > { %279 = sbr.rel (%p276_p2) target bundleno = 2013 (0x7dd), region = 52  ;;  %v465_v2 = vld [vmem:[%s2108_s3 + $0x8] sm:$0xff] (!%p276_p2)  ;;  %v1707_v3 = vpack.c.bf16 (!%p276_p2), %v335_v1, %v334_v0  ;;  %vm1886_vm2 = vmpackc.low (!%p276_p2), %vm370_vm0, %vm370_vm0  ;;  %v464_v6 = vld [vmem:[%s2108_s3] sm:$0xff] (!%p276_p2)  ;;  %p316_p3 = scmp.lt.s32.totalorder (!%p276_p2), %s1508_s13, 3  ;;  %vm570_vm4 = vcmask (!%p276_p2), 261120   ;;  %vm664_vm6 = vcmask (!%p276_p2), 130048  }
   0x7   : > { %v1719_v7 = vpack.c.bf16 (!%p276_p2), %v467_v5, %v465_v2  ;;  %vm1898_vm3 = vmpackc.low (!%p276_p2), %vm476_vm1, %vm476_vm1  ;;  %v466_v9 = vld [vmem:[%s2108_s3 + $0x10] sm:$0xff] (!%p276_p2)  ;;  %v337_v12 = vld [vmem:[%s2107_s2 + $0x18] sm:$0xff] (!%p276_p2)  ;;  %vm1432_vm7 = vcmask (!%p276_p2), 195584  }
   0x8   : > { %v336_v10 = vld [vmem:[%s2107_s2 + $0x10] sm:$0xff] (!%p276_p2)  ;;  %1709 = vmatprep.subr.msk.bf16.mxu0 (!%p276_p2), %vm1886_vm2, %v1707_v3  ;;  %v1722_v11 = vpack.c.bf16 (!%p276_p2), %v466_v9, %v464_v6  ;;  %v469_v13 = vld [vmem:[%s2108_s3 + $0x28] sm:$0xff] (!%p276_p2)  ;;  %v471_v14 = vld [vmem:[%s2108_s3 + $0x38] sm:$0xff] (!%p276_p2) }
   0x9   : > { %1712 = vmatpush3.bf16.xpose.msk.msra.mxu0 (!%p276_p2), %vm1886_vm2, %v1707_v3  ;;  %1721 = vmatprep.subr.msk.bf16.mxu1 (!%p276_p2), %vm1898_vm3, %v1719_v7  ;;  %v1713_v15 = vpack.c.bf16 (!%p276_p2), %v337_v12, %v336_v10  ;;  %v1724_v16 = vpack.c.bf16 (!%p276_p2), %v471_v14, %v469_v13  ;;  %v468_v17 = vld [vmem:[%s2108_s3 + $0x20] sm:$0xff] (!%p276_p2)  ;;  %v470_v18 = vld [vmem:[%s2108_s3 + $0x30] sm:$0xff] (!%p276_p2)  ;;  %v1522_v27 = vld [vmem:[%s2111_s6 + $0x8] ss:$0 sm:$0xff] (!%p276_p2) }
   0xa   : > { %1723 = vmatpush1.bf16.xpose.msra.mxu1 (!%p276_p2), %v1722_v11  ;;  %v1727_v21 = vpack.c.bf16 (!%p276_p2), %v470_v18, %v468_v17  ;;  %v1515_v26 = vld [vmem:[%s2111_s6] ss:$0 sm:$0xff] (!%p276_p2)  ;;  %vm1730_vm5 = vmpackc.low (!%p276_p2), %vm570_vm4, %vm570_vm4  ;;  %v661_v45 = vld [vmem:[%s2112_s7 + $0x8] sm:$0xff] (!%p276_p2) }
   0xb   : > { %1715 = vmatprep.subr.msk.bf16.mxu0 (!%p276_p2), %vm1886_vm2, %v1713_v15  ;;  %1726 = vmatprep.subr.msk.bf16.mxu1 (!%p276_p2), %vm1898_vm3, %v1724_v16  ;;  %v660_v42 = vld [vmem:[%s2112_s7] sm:$0xff] (!%p276_p2)  ;;  %v339_v3 = vld [vmem:[%s2107_s2 + $0x28] sm:$0xff] (!%p276_p2)  ;;  %v340_v6 = vld [vmem:[%s2107_s2 + $0x30] sm:$0xff] (!%p276_p2) }
   0xc   : > { %v338_v2 = vld [vmem:[%s2107_s2 + $0x20] sm:$0xff] (!%p276_p2)  ;;  %v341_v7 = vld [vmem:[%s2107_s2 + $0x38] sm:$0xff] (!%p276_p2) }
   0xd   : > { %s2119_s13 = smov (!%p316_p3, %s1508_s13), 3  ;;  %v1743_v5 = vpack.c.bf16 %v339_v3, %v338_v2  ;;  %v1747_v8 = vpack.c.bf16 %v341_v7, %v340_v6  ;;  %v350_v4 = vld [vmem:[%s2107_s2 + $0x80] sm:$0xff] }
   0xe   : > { %s1509_s29 = sshll.u32 %s2119_s13, 3  ;;  %s1563_s30 = sshll.u32 %s2119_s13, 4 }
   0xf   : > { %s319_s16 = scalar_lea.vmem %s2105_s0, %s1509_s29  ;;  %s326_s19 = scalar_lea.vmem %s2106_s1, %s1563_s30 }
  0x10   : > { %v1942_v19 = vld [vmem:[%s319_s16] sm:$0xff]  ;;  %v363_v20 = vld [vmem:[%s326_s19 + $0x8] sm:$0xff]  ;;  %v365_v24 = vld [vmem:[%s326_s19 + $0x18] sm:$0xff]  ;;  %s332_s17 = scalar_lea.vmem %s2113_s8, %s1509_s29 }
  0x11   : > { %1623 = vmatprep.mubr.msk.f32.mxu0 %vm370_vm0, %v1942_v19  ;;  %1527 = vmatprep.mubr.msk.f32.mxu1 %vm476_vm1, %v363_v20  ;;  %v1952_v22 = vld [vmem:[%s319_s16 + $0x8] sm:$0xff]  ;;  %v362_v23 = vld [vmem:[%s326_s19] sm:$0xff]  ;;  %v364_v25 = vld [vmem:[%s326_s19 + $0x10] sm:$0xff] }
  0x12   : > { %1718 = vmatpush3.bf16.xpose.msk.msra.mxu0 %vm1886_vm2, %v1713_v15  ;;  %1728 = vmatpush1.bf16.xpose.msra.mxu1 %v1727_v21  ;;  %v1537_v20 = vld [vmem:[%s2111_s6 + $0x10] ss:$0 sm:$0xff] }
  0x19   : > { %1624 = vmatmul.mubr.msk.f32.vlgmr.msra.gmra.mrb[0].mxu0 %vm370_vm0, %v1952_v22  ;;  %560 = vmatmul.mubr.f32.vlgmr.msra.gmra.mrb[0].mxu1 %v362_v23 }
  0x1a   : > { %1528 = vmatprep.mubr.msk.f32.mxu1 %vm476_vm1, %v365_v24 }
  0x1d   : > { %565 = vmatmul.mubr.f32.gmra.mrb[2].mxu1 %v364_v25 }
  0xec   : > { %v1625_v28 = vpop.f32.mrb[0].mxu0  ;;  %v561_v31 = vpop.f32.mrb[0].mxu1 }
  0xed   : > { %v1963_v29 = vadd.f32 %v1625_v28, %v1515_v26  ;;  %v455_v30 = vpop.f32.mrb[1].mxu0  ;;  %v1967_v33 = vadd.f32 %v1522_v27, %v561_v31  ;;  %v563_v34 = vpop.f32.mrb[1].mxu1  ;;  %v342_v31 = vld [vmem:[%s2107_s2 + $0x40] sm:$0xff] }
  0xee   : > { %v1965_v32 = vadd.f32 %v1515_v26, %v455_v30  ;;  %v358_v30 = vld [vmem:[%s2109_s4 + $0x10] sm:$0xff] }
  0xef   : > { %1630 = vmatprep.mubr.msk.f32.mxu1 %vm570_vm4, %v1967_v33  ;;  %v344_v34 = vld [vmem:[%s2107_s2 + $0x50] sm:$0xff] }
  0xf0   : > { %v1729_v35 = vpack.c.bf16 %v1963_v29, %v1965_v32  ;;  %v566_v36 = vpop.f32.mrb[2].mxu1 }
  0xf1   : > { %v1975_v37 = vadd.f32 %v1522_v27, %v566_v36  ;;  %v568_v38 = vpop.f32.mrb[3].mxu1 }
  0xf2   : > { %1731 = vmatprep.subr.msk.bf16.mxu1 %vm1730_vm5, %v1729_v35  ;;  %v1218_v38 = vld [vmem:[%s2110_s5 + $0x8] sm:$0xff] }
  0xf3   : > { %1734 = vmatpush3.bf16.xpose.msk.msra.mxu1 %vm1730_vm5, %v1729_v35  ;;  %v1739_v39 = vpack.c.bf16 %v1975_v37, %v1967_v33 }
  0xf4   : > { %1736 = vmatprep.subr.bf16.mxu1 %v1729_v35 }
  0xf5   : > { %1740 = vmatprep.subr.bf16.mxu0 %v1739_v39 }
  0xf6   : > { %1742 = vmatpush3.bf16.msra.mxu0 %v1739_v39  ;;  %v346_v39 = vld [vmem:[%s2107_s2 + $0x60] sm:$0xff] }
  0xf7   : > { %1752 = vmatprep.subr.bf16.mxu0 %v1743_v5 }
  0xfa   : > { %1631 = vmatmul.mubr.msk.f32.vlgmr.msra.gmra.mrb[4].mxu1 %vm570_vm4, %v1975_v37 }
  0xfb   : > { %1738 = vmatpush3.bf16.msra.mxu1 %v1729_v35  ;;  %v345_v35 = vld [vmem:[%s2107_s2 + $0x58] sm:$0xff] }
  0xfc   : > { %1744 = vmatprep.subr.bf16.mxu1 %v1743_v5 }
 0x1cd   : > { %v1632_v40 = vpop.f32.mrb[4].mxu1 }
 0x1ce   : > { %v649_v41 = vpop.f32.mrb[5].mxu1  ;;  %v659_v43 = vmul.f32 0.17677669, %v1632_v40  ;;  %v347_v40 = vld [vmem:[%s2107_s2 + $0x68] sm:$0xff] }
 0x1cf   : > { %v658_v44 = vmul.f32 0.17677669, %v649_v41  ;;  %v1779_v41 = vpack.c.bf16 %v347_v40, %v346_v39 }
 0x1d0   : > { %v663_v48 = vadd.f32 %v661_v45, %v659_v43 }
 0x1d1   : > { %v662_v46 = vadd.f32 %v660_v42, %v658_v44 }
 0x1d2   : > { %v668_v49 = vsel %vm664_vm6, %v663_v48, -inf }
 0x1d3   : > { %v665_v47 = vsel %vm664_vm6, %v662_v46, -inf }
 0x1d4   : > { %666 = vmax.xlane.f32.xlu0 %v665_v47 }
 0x1d8   : > { %669 = vmax.xlane.f32.xlu0 %v668_v49  ;;  %v359_v49 = vld [vmem:[%s2109_s4 + $0x18] sm:$0xff] }
 0x261   : > { %v667_v50 = vpop.xlane.xlu0 %666 }
 0x262   : > { %v671_v51 = vsub.f32 %v662_v46, %v667_v50  ;;  %v356_v50 = vld [vmem:[%s2109_s4] sm:$0xff] }
 0x264   : > { %v673_v52 = vmul.f32 1.442695, %v671_v51  ;;  %v357_v51 = vld [vmem:[%s2109_s4 + $0x8] sm:$0xff] }
 0x265   : > { %v670_v53 = vpop.xlane.xlu0 %669 }
 0x266   : > { %1805 = vpow2.f32 %v673_v52  ;;  %v672_v54 = vsub.f32 %v663_v48, %v670_v53  ;;  %v348_v52 = vld [vmem:[%s2107_s2 + $0x70] sm:$0xff]  ;;  %v349_v53 = vld [vmem:[%s2107_s2 + $0x78] sm:$0xff] }
 0x268   : > { %v675_v55 = vmul.f32 1.442695, %v672_v54  ;;  %v1785_v54 = vpack.c.bf16 %v349_v53, %v348_v52 }
 0x26a   : > { %1807 = vpow2.f32 %v675_v55 }
 0x270   : > { %v1806_v56 = vpop.eup %1805 }
 0x271   : > { %v677_v57 = vsel %vm664_vm6, %v1806_v56, 0.0 }
 0x272   : > { %678 = vadd.xlane.f32.xlu1 %v677_v57 }
 0x274   : > { %v1808_v58 = vpop.eup %1807 }
 0x275   : > { %v680_v59 = vsel %vm664_vm6, %v1808_v58, 0.0 }
 0x276   : > { %681 = vadd.xlane.f32.xlu1 %v680_v59 }
 0x2ff   : > { %v679_v60 = vpop.xlane.xlu1 %678 }
 0x300   : > { %1809 = vrcp.f32 %v679_v60 }
 0x303   : > { %v682_v61 = vpop.xlane.xlu1 %681 }
 0x304   : > { %1811 = vrcp.f32 %v682_v61 }
 0x30a   : > { %v1810_v62 = vpop.eup %1809 }
 0x30b   : > { %v685_v63 = vmul.f32 %v1810_v62, %v1806_v56 }
 0x30d   : > { %770 = vxpose.xlu0.b32.start [1/2] (short) (narrow) %v685_v63, 16  ;;  %1637 = vmatprep.mubr.msk.f32.mxu1 %vm664_vm6, %v685_v63  ;;  %v1546_v63 = vld [vmem:[%s2111_s6 + $0x18] ss:$0 sm:$0xff] }
 0x30e   : > { %v1812_v0 = vpop.eup %1811 }
 0x30f   : > { %v686_v1 = vmul.f32 %v1812_v0, %v1808_v58 }
 0x311   : > { %771 = vxpose.xlu0.b32.end [2/2] (short) (narrow) %v686_v1, 16  ;;  %1638 = vmatmul.mubr.msk.f32.vlgmr.msra.gmra.mrb[6].mxu1 %vm664_vm6, %v686_v1 }
 0x312   : > { %1746 = vmatpush3.bf16.msra.mxu1 %v1743_v5 }
 0x313   : > { %1748 = vmatprep.subr.bf16.mxu1 %v1747_v8 }
 0x316   : > { %1750 = vmatpush3.bf16.msra.mxu1 %v1747_v8 }
 0x38d   : > { %v786_v9 = vpop.trf.xlu0 }
 0x38e   : > { %1644 = vmatprep.mubr.msk.f32.mxu0 %vm664_vm6, %v786_v9 }
 0x391   : > { %v787_v10 = vpop.trf.xlu0 }
 0x392   : > { %1645 = vmatmul.mubr.msk.f32.vlgmr.msra.gmra.mrb[2].mxu0 %vm664_vm6, %v787_v10 }
 0x393   : > { %1754 = vmatpush3.bf16.msra.mxu0 %v1743_v5  ;;  %v1555_v5 = vld [vmem:[%s2111_s6 + $0x20] ss:$0 sm:$0xff] }
 0x394   : > { %1756 = vmatprep.subr.bf16.mxu0 %v1747_v8 }
 0x397   : > { %1758 = vmatpush3.bf16.msra.mxu0 %v1747_v8 }
 0x3e4   : > { %v1639_v11 = vpop.f32.mrb[6].mxu1 }
 0x3e5   : > { %v759_v12 = vpop.f32.mrb[7].mxu1  ;;  %v769_v14 = vadd.f32 %v1639_v11, %v1975_v37  ;;  %v1773_v37 = vpack.c.bf16 %v345_v35, %v344_v34 }
 0x3e6   : > { %v768_v13 = vadd.f32 %v759_v12, %v1967_v33  ;;  %v343_v33 = vld [vmem:[%s2107_s2 + $0x48] sm:$0xff] }
 0x3e7   : > { %v1767_v36 = vpack.c.bf16 %v343_v33, %v342_v31 }
 0x3e8   : > { %1655 = vmatprep.mubr.msk.f32.mxu1 %vm570_vm4, %v768_v13 }
 0x3e9   : > { %1656 = vmatmul.mubr.msk.f32.vlgmr.msra.gmra.mrb[8].mxu1 %vm570_vm4, %v769_v14  ;;  %1769 = vmatprep.subr.msk.bf16.mxu0 %vm1886_vm2, %v1767_v36 }
 0x3ea   : > { %1673 = vmatprep.mubr.msk.f32.mxu1 %vm664_vm6, %v358_v30 }
 0x465   : > { %v1646_v15 = vpop.f32.mrb[2].mxu0 }
 0x466   : > { %v874_v16 = vpop.f32.mrb[3].mxu0  ;;  %v884_v18 = vadd.f32 %v1646_v15, %v1963_v29  ;;  %v1217_v29 = vld [vmem:[%s2110_s5] sm:$0xff] }
 0x467   : > { %v883_v17 = vadd.f32 %v874_v16, %v1965_v32  ;;  %v1821_v32 = vmov 0  }
 0x468   : > { %1803 = vset.pattern.permute.xlu1 %v1821_v32  ;;  %1804 = vset.pattern.permute.xlu0 %v1821_v32 }
 0x469   : > { %1666 = vmatprep.mubr.msk.f32.mxu0 %vm570_vm4, %v883_v17  ;;  %1221 = vperm.xlu1 %1803, %v1217_v29  }
 0x46a   : > { %1667 = vmatmul.mubr.msk.f32.vlgmr.msra.gmra.mrb[4].mxu0 %vm570_vm4, %v884_v18 }
 0x46b   : > { %1772 = vmatpush3.bf16.xpose.msk.msra.mxu0 %vm1886_vm2, %v1767_v36 }
 0x46c   : > { %1775 = vmatprep.subr.msk.bf16.mxu0 %vm1886_vm2, %v1773_v37 }
 0x46d   : > { %1226 = vperm.xlu1 %1803, %v1218_v38  }
 0x473   : > { %1778 = vmatpush3.bf16.xpose.msk.msra.mxu0 %vm1886_vm2, %v1773_v37 }
 0x474   : > { %1781 = vmatprep.subr.msk.bf16.mxu0 %vm1886_vm2, %v1779_v41 }
 0x47b   : > { %1784 = vmatpush3.bf16.xpose.msk.msra.mxu0 %vm1886_vm2, %v1779_v41 }
 0x4bc   : > { %v1657_v21 = vpop.f32.mrb[8].mxu1 }
 0x4bd   : > { %v967_v23 = vadd.f32 %v1657_v21, %v1537_v20  ;;  %v961_v24 = vpop.f32.mrb[9].mxu1 }
 0x4be   : > { %v962_v25 = vadd.f32 %v1537_v20, %v961_v24 }
 0x4bf   : > { %v971_v26 = vmax.f32 %v967_v23, 0.0 }
 0x4c0   : > { %v970_v27 = vmax.f32 %v962_v25, 0.0 }
 0x4c2   : > { %v1763_v28 = vpack.c.bf16 %v971_v26, %v970_v27 }
 0x4e8   : > { %v1222_v55 = vpop.permute.xlu1 %1221 }
 0x4ec   : > { %v1227_v56 = vpop.permute.xlu1 %1226 }
 0x53d   : > { %v1668_v42 = vpop.f32.mrb[4].mxu0 }
 0x53e   : > { %v1050_v43 = vadd.f32 %v1668_v42, %v1537_v20  ;;  %v1044_v44 = vpop.f32.mrb[5].mxu0 }
 0x53f   : > { %v1045_v45 = vadd.f32 %v1537_v20, %v1044_v44 }
 0x540   : > { %v1054_v46 = vmax.f32 %v1050_v43, 0.0 }
 0x541   : > { %v1053_v47 = vmax.f32 %v1045_v45, 0.0 }
 0x543   : > { %v1759_v48 = vpack.c.bf16 %v1054_v46, %v1053_v47 }
 0x545   : > { %1760 = vmatprep.subr.bf16.mxu1 %v1759_v48 }
 0x546   : > { %1762 = vmatpush3.bf16.msra.mxu1 %v1759_v48 }
 0x547   : > { %1764 = vmatprep.subr.bf16.mxu1 %v1763_v28 }
 0x549   : > { %1674 = vmatmul.mubr.msk.f32.vlgmr.msra.gmra.mrb[10].mxu1 %vm664_vm6, %v359_v49 }
 0x54a   : > { %1766 = vmatpush3.bf16.msra.mxu1 %v1763_v28  ;;  %1680 = vmatprep.mubr.msk.f32.mxu1 %vm664_vm6, %v356_v50 }
 0x54b   : > { %1787 = vmatprep.subr.msk.bf16.mxu1 %vm1886_vm2, %v1785_v54 }
 0x551   : > { %1681 = vmatmul.mubr.msk.f32.vlgmr.msra.gmra.mrb[10].mxu1 %vm664_vm6, %v357_v51 }
 0x553   : > { %1790 = vmatpush3.bf16.xpose.msk.msra.mxu1 %vm1886_vm2, %v1785_v54 }
 0x554   : > { %1702 = vmatprep.subr.msk.mxu1 %vm370_vm0, %v350_v4 }
 0x55b   : > { %1703 = vmatpush3.xpose.msk.msra.mxu1 %vm370_vm0, %v350_v4 }
 0x624   : > { %v1682_v57 = vpop.f32.mrb[10].mxu1 }
 0x625   : > { %v1230_v58 = vadd.f32 %v1682_v57, %v1227_v56  ;;  %v1208_v59 = vpop.f32.mrb[11].mxu1 }
 0x626   : > { %v1229_v60 = vadd.f32 %v1222_v55, %v1208_v59 }
 0x627   : > { %v1232_v62 = vadd.f32 %v1230_v58, %v1952_v22 }
 0x628   : > { %v1231_v61 = vadd.f32 %v1229_v60, %v1942_v19 }
 0x62a   : > { %1695 = vmatprep.mubr.msk.f32.mxu0 %vm370_vm0, %v1231_v61 }
 0x62b   : > { %1696 = vmatmul.mubr.msk.f32.vlgmr.msra.gmra.mrb[6].mxu0 %vm370_vm0, %v1232_v62 }
 0x6fe   : > { %v1697_v19 = vpop.f32.mrb[6].mxu0 }
 0x6ff   : > { %v1333_v0 = vadd.f32 %v1697_v19, %v1546_v63  ;;  %v1327_v22 = vpop.f32.mrb[7].mxu0 }
 0x700   : > { %v1328_v1 = vadd.f32 %v1546_v63, %v1327_v22 }
 0x701   : > { %v1337_v3 = vmax.f32 %v1333_v0, 0.0 }
 0x702   : > { %v1336_v2 = vmax.f32 %v1328_v1, 0.0 }
 0x704   : > { %1704 = vmatprep.mubr.msk.f32.mxu1 %vm370_vm0, %v1336_v2 }
 0x705   : > { %1705 = vmatmul.mubr.msk.f32.vlgmr.msra.gmra.mrb[12].mxu1 %vm370_vm0, %v1337_v3 }
 0x7d8   : > { %v1706_v6 = vpop.f32.mrb[12].mxu1 }
 0x7d9   : > { %v1423_v7 = vpop.f32.mrb[13].mxu1  ;;  %v1429_v9 = vadd.f32 %v1706_v6, %v1555_v5 }
 0x7da   : > { %v1424_v8 = vadd.f32 %v1555_v5, %v1423_v7 }
 0x7db   : > { %1434 = vst.msk [vmem:[%s332_s17 + $0x8] sm:$0xff] %vm1432_vm7, %v1429_v9 }
 0x7dc   : > { %1433 = vst.msk [vmem:[%s332_s17] sm:$0xff] %vm1432_vm7, %v1424_v8 }
 0x7dd PF: > { %s18_s27 = sadd.s32 1, %s1819_s27  }
 0x7de   : > { %p15_p4 = scmp.ge.s32.totalorder %s18_s27, 4  }
 0x7e0   :  { %17 = sbr.rel (!%p15_p4) target bundleno = 1 (0x1), region = 85 }

</bundles_post_ra>
